<compile_context>
chip_gen: v5e
topology: v5e:2x2
jax: 0.10.0
libtpu: 0.0.40
codegen_flags: <defaults>
</compile_context>

<pallas_src>
import math

import jax
import jax.numpy as jnp
from jax.experimental import pallas as pl
from jax.experimental.pallas import tpu as pltpu


def _round_up(x, m):
    return ((x + m - 1) // m) * m


def _fused_conv_stack_kernel(x_ref, w_ref, b_ref, o_ref):
    # x_ref: (TILE_M, Cpad) f32
    # w_ref: (n_layers, Cpad, Cpad) f32   (zero-padded per-layer weights)
    # b_ref: (n_layers, 1, Cpad) f32      (zero-padded per-layer biases)
    # o_ref: (TILE_M, Cpad) f32
    n_layers = w_ref.shape[0]
    h = x_ref[...]
    for l in range(n_layers):                      # static unrolled layer loop
        y = jnp.dot(h, w_ref[l], preferred_element_type=jnp.float32)
        y = y + b_ref[l]                           # broadcast bias over rows
        h = jnp.maximum(y, 0.0)                    # ReLU in f32 (VPU fast path)
    o_ref[...] = h.astype(o_ref.dtype)


def convolutional_forward(params, x, *, tile_m=512):
    """Equivalent of Convolutional.forward (kernel_size=1).

    x: (B, L, in_dim) float32  ->  (B, L, h_dim) float32
    params: list of (w: (cin, cout), b: (cout,)) per layer.
    """
    B, L, Cin = x.shape
    n_layers = len(params)
    Cout = params[-1][0].shape[1]

    # Lane-dense channel padding (multiple of 128), shared across all layers.
    cmax = max([Cin] + [w.shape[1] for w, _ in params])
    Cpad = _round_up(max(cmax, 128), 128)

    # Row tiling: tile_m rows per grid step, tile_m a multiple of 8.
    M = B * L
    tile_m = min(tile_m, _round_up(M, 8))
    tile_m = _round_up(tile_m, 8)
    Mpad = _round_up(M, tile_m)

    # Zero-pad activations / weights / biases.  Padded input channels are zero
    # and padded weight rows/cols are zero, so padded output channels stay at
    # relu(0) == 0 through every layer -> real channels are exact.
    xp = jnp.zeros((Mpad, Cpad), jnp.float32).at[:M, :Cin].set(
        x.reshape(M, Cin).astype(jnp.float32))
    W = jnp.zeros((n_layers, Cpad, Cpad), jnp.float32)
    Bb = jnp.zeros((n_layers, 1, Cpad), jnp.float32)
    for l, (w, b) in enumerate(params):
        cin, cout = w.shape
        W = W.at[l, :cin, :cout].set(w)
        Bb = Bb.at[l, 0, :cout].set(b.reshape(-1))

    grid = (Mpad // tile_m,)
    flops = 2 * Mpad * Cpad * Cpad * n_layers
    bytes_accessed = (2 * Mpad * Cpad + n_layers * (Cpad * Cpad + Cpad)) * 4

    out = pl.pallas_call(
        _fused_conv_stack_kernel,
        out_shape=jax.ShapeDtypeStruct((Mpad, Cpad), jnp.float32),
        grid=grid,
        in_specs=[
            # Activation tile streams through the pipeline.
            pl.BlockSpec((tile_m, Cpad), lambda i: (i, 0)),
            # Weights/biases: constant block -> stay resident in VMEM.
            pl.BlockSpec((n_layers, Cpad, Cpad), lambda i: (0, 0, 0)),
            pl.BlockSpec((n_layers, 1, Cpad), lambda i: (0, 0, 0)),
        ],
        out_specs=pl.BlockSpec((tile_m, Cpad), lambda i: (i, 0)),
        compiler_params=pltpu.CompilerParams(
            dimension_semantics=("parallel",),      # shard row tiles on v7x 2TC
            vmem_limit_bytes=32 * 1024 * 1024,      # fits v5e/v6e/v7x scoped VMEM
        ),
        cost_estimate=pl.CostEstimate(
            flops=flops, transcendentals=0, bytes_accessed=bytes_accessed),
    )(xp, W, Bb)

    return out[:M, :Cout].reshape(B, L, Cout)


def init_convolutional_params(key, in_dim, h_dim, n_layers):
    """Deterministic params mimicking PyTorch Conv1d default init (kernel=1).

    Stored as (in, out) weights and (out,) biases for the matmul form.
    """
    params = []
    dims = [in_dim] + [h_dim] * n_layers
    for layer in range(n_layers):
        cin, cout = dims[layer], dims[layer + 1]
        key, kw, kb = jax.random.split(key, 3)
        bound = 1.0 / math.sqrt(cin)  # fan_in = cin * kernel_size(=1)
        w = jax.random.uniform(kw, (cin, cout), jnp.float32, -bound, bound)
        b = jax.random.uniform(kb, (cout,), jnp.float32, -bound, bound)
        params.append((w, b))
    return params


def _reference_forward(params, x):
    h = x
    for w, b in params:
        h = jnp.maximum(jnp.einsum("blc,ch->blh", h, w) + b[None, None, :], 0.0)
    return h


if __name__ == "__main__":
    B, L, in_dim, h_dim, n_layers = 2, 8, 4, 32, 2

    key = jax.random.PRNGKey(0)
    key, kx = jax.random.split(key)
    x = jax.random.normal(kx, (B, L, in_dim), dtype=jnp.float32)

    params = init_convolutional_params(key, in_dim, h_dim, n_layers)

    out = convolutional_forward(params, x)
    out = jax.block_until_ready(out)

    ref = _reference_forward(params, x)
    assert out.shape == (B, L, h_dim)
    assert jnp.allclose(out, ref, atol=1e-5, rtol=1e-5)

    print("KERNEL_OK")
</pallas_src>

<mosaic_0001>
module attributes {stable_mosaic.version = 11 : i64} {
  func.func @_fused_conv_stack_kernel(%arg0: i32, %arg1: memref<16x128xf32, #tpu.memory_space<vmem>>, %arg2: memref<2x128x128xf32, #tpu.memory_space<vmem>>, %arg3: memref<2x1x128xf32, #tpu.memory_space<vmem>>, %arg4: memref<16x128xf32, #tpu.memory_space<vmem>>) attributes {dimension_semantics = [#tpu.dimension_semantics<parallel>], iteration_bounds = array<i64: 1>, scalar_prefetch = 0 : i64, scratch_operands = 0 : i64, tpu.core_type = #tpu.core_type<tc>, window_params = [{transform_indices = @transform_0, window_bounds = array<i64: 16, 128>}, {pipeline_mode = #tpu.pipeline_mode<synchronous>, transform_indices = @transform_1, window_bounds = array<i64: 2, 128, 128>}, {pipeline_mode = #tpu.pipeline_mode<synchronous>, transform_indices = @transform_2, window_bounds = array<i64: 2, 1, 128>}, {transform_indices = @transform_3, window_bounds = array<i64: 16, 128>}]} {
    %c0 = arith.constant 0 : index
    %c0_0 = arith.constant 0 : index
    %0 = vector.load %arg1[%c0, %c0_0] : memref<16x128xf32, #tpu.memory_space<vmem>>, vector<16x128xf32>
    %c0_1 = arith.constant 0 : index
    %c0_2 = arith.constant 0 : index
    %c0_3 = arith.constant 0 : index
    %1 = vector.load %arg2[%c0_1, %c0_2, %c0_3] : memref<2x128x128xf32, #tpu.memory_space<vmem>>, vector<1x128x128xf32>
    %2 = vector.shape_cast %1 : vector<1x128x128xf32> to vector<128x128xf32>
    %cst = arith.constant dense<0.000000e+00> : vector<16x128xf32>
    %3 = tpu.matmul %0, %2, %cst {dimension_numbers = #tpu.dot_dimension_numbers<[1], [0], [0], [1], [0, 0, 1, 1], [], []>} : vector<16x128xf32>, vector<128x128xf32>, vector<16x128xf32> -> vector<16x128xf32>
    %c0_4 = arith.constant 0 : index
    %c0_5 = arith.constant 0 : index
    %c0_6 = arith.constant 0 : index
    %4 = vector.load %arg3[%c0_4, %c0_5, %c0_6] : memref<2x1x128xf32, #tpu.memory_space<vmem>>, vector<1x1x128xf32>
    %5 = vector.shape_cast %4 : vector<1x1x128xf32> to vector<1x128xf32>
    %6 = vector.broadcast %5 : vector<1x128xf32> to vector<16x128xf32>
    %7 = arith.addf %3, %6 : vector<16x128xf32>
    %cst_7 = arith.constant 0.000000e+00 : f32
    %8 = vector.broadcast %cst_7 : f32 to vector<16x128xf32>
    %9 = arith.maximumf %7, %8 : vector<16x128xf32>
    %c1 = arith.constant 1 : index
    %c0_8 = arith.constant 0 : index
    %c0_9 = arith.constant 0 : index
    %10 = vector.load %arg2[%c1, %c0_8, %c0_9] : memref<2x128x128xf32, #tpu.memory_space<vmem>>, vector<1x128x128xf32>
    %11 = vector.shape_cast %10 : vector<1x128x128xf32> to vector<128x128xf32>
    %cst_10 = arith.constant dense<0.000000e+00> : vector<16x128xf32>
    %12 = tpu.matmul %9, %11, %cst_10 {dimension_numbers = #tpu.dot_dimension_numbers<[1], [0], [0], [1], [0, 0, 1, 1], [], []>} : vector<16x128xf32>, vector<128x128xf32>, vector<16x128xf32> -> vector<16x128xf32>
    %c1_11 = arith.constant 1 : index
    %c0_12 = arith.constant 0 : index
    %c0_13 = arith.constant 0 : index
    %13 = vector.load %arg3[%c1_11, %c0_12, %c0_13] : memref<2x1x128xf32, #tpu.memory_space<vmem>>, vector<1x1x128xf32>
    %14 = vector.shape_cast %13 : vector<1x1x128xf32> to vector<1x128xf32>
    %15 = vector.broadcast %14 : vector<1x128xf32> to vector<16x128xf32>
    %16 = arith.addf %12, %15 : vector<16x128xf32>
    %cst_14 = arith.constant 0.000000e+00 : f32
    %17 = vector.broadcast %cst_14 : f32 to vector<16x128xf32>
    %18 = arith.maximumf %16, %17 : vector<16x128xf32>
    %c0_15 = arith.constant 0 : index
    %c0_16 = arith.constant 0 : index
    %19 = vector.load %arg4[%c0_15, %c0_16] : memref<16x128xf32, #tpu.memory_space<vmem>>, vector<16x128xf32>
    tpu.vector_store %arg4[%c0_15, %c0_16], %18 {strides = array<i32>} : memref<16x128xf32, #tpu.memory_space<vmem>>, vector<16x128xf32>,
    return
  }
  func.func @transform_0(%arg0: i32) -> (i32, i32) {
    %c0_i32 = arith.constant 0 : i32
    %c0_i32_0 = arith.constant 0 : i32
    return %arg0, %c0_i32 : i32, i32
  }
  func.func @transform_1(%arg0: i32) -> (i32, i32, i32) {
    %c0_i32 = arith.constant 0 : i32
    %c0_i32_0 = arith.constant 0 : i32
    %c0_i32_1 = arith.constant 0 : i32
    %c0_i32_2 = arith.constant 0 : i32
    return %c0_i32, %c0_i32_0, %c0_i32_1 : i32, i32, i32
  }
  func.func @transform_2(%arg0: i32) -> (i32, i32, i32) {
    %c0_i32 = arith.constant 0 : i32
    %c0_i32_0 = arith.constant 0 : i32
    %c0_i32_1 = arith.constant 0 : i32
    %c0_i32_2 = arith.constant 0 : i32
    return %c0_i32, %c0_i32_0, %c0_i32_1 : i32, i32, i32
  }
  func.func @transform_3(%arg0: i32) -> (i32, i32) {
    %c0_i32 = arith.constant 0 : i32
    %c0_i32_0 = arith.constant 0 : i32
    return %arg0, %c0_i32 : i32, i32
  }
}

</mosaic_0001>

<bundles_post_ra>
// kernel: tpu_custom_call.1
= control target key start
LH: loop header
LB: loop body
LE: loop exit
PB: predicated region body
PF: predicated region fallthrough
CT: control target
= control target key end

     0   :  { %8 = vsyncpa [#allocation3], 0  ;;  %s371_s0 = inlined_call_operand.hbm [shape: f32[16,128], index: 0, kind: input, shape index: {}]   ;;  %s372_s1 = inlined_call_operand.hbm [shape: f32[2,128,128], index: 1, kind: input, shape index: {}]   ;;  %s373_s2 = inlined_call_operand.hbm [shape: f32[2,1,128], index: 2, kind: input, shape index: {}]   ;;  %s374_s3 = inlined_call_operand.hbm [shape: f32[16,128], index: 3, kind: output, shape index: {}]  }
   0x1   :  { %9 = vsyncpa [#allocation6], 0 }
   0x2   :  { %10 = vsyncpa [#allocation4], 0  ;;  %s28_s14 = sshll.u32 %s372_s1, 4  ;;  %s322_s15 = smov [#allocation5]   ;;  %s29_s14 = int_to_ptr.hbm [resolvable:$true] %s28_s14 }
   0x3   :  { %s30_s16 = sshll.u32 %s322_s15, 4  ;;  %s15_s19 = sshll.u32 %s371_s0, 4  ;;  %s31_s16 = int_to_ptr.vmem [resolvable:$true] %s30_s16  ;;  %s16_s19 = int_to_ptr.hbm [resolvable:$true] %s15_s19 }
   0x4   :  { %s323_s20 = smov 128   ;;  %s324_s21 = smov 8  }
   0x5   :  { %36 = dma.hbm_to_vmem [thread:$0]  %s29_s14, 4096, %s31_s16, [#allocation6], %s323_s20, %s323_s20, %s324_s21  }
   0x6   :  { %s325_s22 = smov [#allocation2]   ;;  %s41_s1 = sshll.u32 %s373_s2, 4  ;;  %s42_s1 = int_to_ptr.hbm [resolvable:$true] %s41_s1 }
   0x7   :  { %s17_s23 = sshll.u32 %s325_s22, 4  ;;  %s326_s0 = smov [#allocation7]   ;;  %s18_s23 = int_to_ptr.vmem [resolvable:$true] %s17_s23 }
   0x8   :  { %23 = dma.hbm_to_vmem [thread:$0]  %s16_s19, 256, %s18_s23, [#allocation3], %s323_s20, %s323_s20, %s324_s21  }
   0x9   :  { %s43_s26 = sshll.u32 %s326_s0, 4  ;;  %s327_s27 = smov 16   ;;  %s44_s26 = int_to_ptr.vmem [resolvable:$true] %s43_s26 }
   0xa   :  { %s328_s28 = smov 1  }
   0xb   :  { %49 = dma.hbm_to_vmem [thread:$0]  %s42_s1, 32, %s44_s26, [#allocation6], %s327_s27, %s327_s27, %s328_s28  }
   0xc   :  { %316 = dma.done.wait [#allocation3], 256  }
   0xd   :  { %317 = vsyncadd [#allocation3], 4294967040 }
   0xe   :  { %318 = dma.done.wait [#allocation6], 4128  }
   0xf   :  { %319 = vsyncadd [#allocation6], 4294963168  ;;  %v79_v0 = vld [vmem:[#allocation5 + $0x78] sm:$0xff]  ;;  %v78_v1 = vld [vmem:[#allocation5 + $0x70] sm:$0xff]  ;;  %s329_s2 = smov [#allocation8]   ;;  %s164_s5 = sshll.u32 %s374_s3, 4  ;;  %s165_s5 = int_to_ptr.hbm [resolvable:$true] %s164_s5 }
  0x10   :  { %178 = vmatpush.msra.mxu2 %v79_v0  ;;  %84 = vmatpush.msra.mxu0 %v79_v0  ;;  %v77_v2 = vld [vmem:[#allocation5 + $0x68] sm:$0xff]  ;;  %v76_v3 = vld [vmem:[#allocation5 + $0x60] sm:$0xff]  ;;  %v75_v4 = vld [vmem:[#allocation5 + $0x58] sm:$0xff]  ;;  %s162_s29 = sshll.u32 %s329_s2, 4  ;;  %s163_s29 = int_to_ptr.vmem [resolvable:$true] %s162_s29 }
  0x11   :  { %v125_v5 = vld [vmem:[#allocation5 + $0xf8] sm:$0xff]  ;;  %v124_v6 = vld [vmem:[#allocation5 + $0xf0] sm:$0xff]  ;;  %v123_v8 = vld [vmem:[#allocation5 + $0xe8] sm:$0xff] }
  0x12   :  { %179 = vmatpush.msra.mxu2 %v78_v1  ;;  %85 = vmatpush.msra.mxu0 %v78_v1  ;;  %v74_v7 = vld [vmem:[#allocation5 + $0x50] sm:$0xff]  ;;  %v73_v9 = vld [vmem:[#allocation5 + $0x48] sm:$0xff]  ;;  %v122_v10 = vld [vmem:[#allocation5 + $0xe0] sm:$0xff] }
  0x13   :  { %194 = vmatpush.msra.mxu3 %v125_v5  ;;  %131 = vmatpush.msra.mxu1 %v125_v5  ;;  %v72_v11 = vld [vmem:[#allocation5 + $0x40] sm:$0xff]  ;;  %v121_v12 = vld [vmem:[#allocation5 + $0xd8] sm:$0xff]  ;;  %v120_v14 = vld [vmem:[#allocation5 + $0xd0] sm:$0xff] }
  0x14   :  { %180 = vmatpush.msra.mxu2 %v77_v2  ;;  %86 = vmatpush.msra.mxu0 %v77_v2  ;;  %v71_v13 = vld [vmem:[#allocation5 + $0x38] sm:$0xff]  ;;  %v70_v15 = vld [vmem:[#allocation5 + $0x30] sm:$0xff]  ;;  %v119_v16 = vld [vmem:[#allocation5 + $0xc8] sm:$0xff] }
  0x15   :  { %195 = vmatpush.msra.mxu3 %v124_v6  ;;  %132 = vmatpush.msra.mxu1 %v124_v6  ;;  %v69_v17 = vld [vmem:[#allocation5 + $0x28] sm:$0xff]  ;;  %v118_v18 = vld [vmem:[#allocation5 + $0xc0] sm:$0xff]  ;;  %v117_v20 = vld [vmem:[#allocation5 + $0xb8] sm:$0xff] }
  0x16   :  { %181 = vmatpush.msra.mxu2 %v76_v3  ;;  %87 = vmatpush.msra.mxu0 %v76_v3  ;;  %v68_v19 = vld [vmem:[#allocation5 + $0x20] sm:$0xff]  ;;  %v67_v21 = vld [vmem:[#allocation5 + $0x18] sm:$0xff]  ;;  %v116_v22 = vld [vmem:[#allocation5 + $0xb0] sm:$0xff] }
  0x17   :  { %196 = vmatpush.msra.mxu3 %v123_v8  ;;  %133 = vmatpush.msra.mxu1 %v123_v8  ;;  %v66_v23 = vld [vmem:[#allocation5 + $0x10] sm:$0xff]  ;;  %v115_v24 = vld [vmem:[#allocation5 + $0xa8] sm:$0xff]  ;;  %v114_v26 = vld [vmem:[#allocation5 + $0xa0] sm:$0xff] }
  0x18   :  { %182 = vmatpush.msra.mxu2 %v75_v4  ;;  %88 = vmatpush.msra.mxu0 %v75_v4  ;;  %v65_v25 = vld [vmem:[#allocation5 + $0x8] sm:$0xff]  ;;  %v64_v27 = vld [vmem:[#allocation5] sm:$0xff]  ;;  %v63_v28 = vld [vmem:[#allocation2 + $0x8] sm:$0xff] }
  0x19   :  { %197 = vmatpush.msra.mxu3 %v122_v10  ;;  %134 = vmatpush.msra.mxu1 %v122_v10  ;;  %v62_v29 = vld [vmem:[#allocation2] sm:$0xff]  ;;  %v113_v30 = vld [vmem:[#allocation5 + $0x98] sm:$0xff]  ;;  %v111_v32 = vld [vmem:[#allocation5 + $0x88] sm:$0xff] }
  0x1a   :  { %183 = vmatpush.msra.mxu2 %v74_v7  ;;  %89 = vmatpush.msra.mxu0 %v74_v7  ;;  %v112_v31 = vld [vmem:[#allocation5 + $0x90] sm:$0xff]  ;;  %v110_v33 = vld [vmem:[#allocation5 + $0x80] sm:$0xff] }
  0x1b   :  { %198 = vmatpush.msra.mxu3 %v121_v12  ;;  %135 = vmatpush.msra.mxu1 %v121_v12  ;;  %v218_v34 = vld [vmem:[#allocation7] ss:$0 sm:$0xff]  ;;  %v219_v41 = vld [vmem:[#allocation7 + $0x1] ss:$0 sm:$0xff] }
  0x1c   :  { %184 = vmatpush.msra.mxu2 %v73_v9  ;;  %90 = vmatpush.msra.mxu0 %v73_v9 }
  0x1d   :  { %199 = vmatpush.msra.mxu3 %v120_v14  ;;  %136 = vmatpush.msra.mxu1 %v120_v14 }
  0x1e   :  { %185 = vmatpush.msra.mxu2 %v72_v11  ;;  %91 = vmatpush.msra.mxu0 %v72_v11 }
  0x1f   :  { %200 = vmatpush.msra.mxu3 %v119_v16  ;;  %137 = vmatpush.msra.mxu1 %v119_v16 }
  0x20   :  { %186 = vmatpush.msra.mxu2 %v71_v13  ;;  %92 = vmatpush.msra.mxu0 %v71_v13 }
  0x21   :  { %201 = vmatpush.msra.mxu3 %v118_v18  ;;  %138 = vmatpush.msra.mxu1 %v118_v18 }
  0x22   :  { %187 = vmatpush.msra.mxu2 %v70_v15  ;;  %93 = vmatpush.msra.mxu0 %v70_v15 }
  0x23   :  { %202 = vmatpush.msra.mxu3 %v117_v20  ;;  %139 = vmatpush.msra.mxu1 %v117_v20 }
  0x24   :  { %188 = vmatpush.msra.mxu2 %v69_v17  ;;  %94 = vmatpush.msra.mxu0 %v69_v17 }
  0x25   :  { %203 = vmatpush.msra.mxu3 %v116_v22  ;;  %140 = vmatpush.msra.mxu1 %v116_v22 }
  0x26   :  { %189 = vmatpush.msra.mxu2 %v68_v19  ;;  %95 = vmatpush.msra.mxu0 %v68_v19 }
  0x27   :  { %204 = vmatpush.msra.mxu3 %v115_v24  ;;  %141 = vmatpush.msra.mxu1 %v115_v24 }
  0x28   :  { %190 = vmatpush.msra.mxu2 %v67_v21  ;;  %96 = vmatpush.msra.mxu0 %v67_v21 }
  0x29   :  { %205 = vmatpush.msra.mxu3 %v114_v26  ;;  %142 = vmatpush.msra.mxu1 %v114_v26 }
  0x2a   :  { %191 = vmatpush.msra.mxu2 %v66_v23  ;;  %97 = vmatpush.msra.mxu0 %v66_v23 }
  0x2b   :  { %206 = vmatpush.msra.mxu3 %v113_v30  ;;  %143 = vmatpush.msra.mxu1 %v113_v30 }
  0x2c   :  { %192 = vmatpush.msra.mxu2 %v65_v25  ;;  %98 = vmatpush.msra.mxu0 %v65_v25 }
  0x2d   :  { %207 = vmatpush.msra.mxu3 %v112_v31  ;;  %144 = vmatpush.msra.mxu1 %v112_v31 }
  0x2e   :  { %193 = vmatpush.msra.mxu2 %v64_v27  ;;  %99 = vmatpush.msra.mxu0 %v64_v27 }
  0x2f   :  { %103 = vmatmul.f32.vlgmr.msra.gmra.mxu2 %v63_v28  ;;  %100 = vmatmul.f32.vlgmr.msra.gmra.mxu0 %v62_v29 }
  0x30   :  { %208 = vmatpush.msra.mxu3 %v111_v32  ;;  %145 = vmatpush.msra.mxu1 %v111_v32 }
  0x32   :  { %209 = vmatpush.msra.mxu3 %v110_v33  ;;  %146 = vmatpush.msra.mxu1 %v110_v33 }
  0xac   :  { %v101_v35 = vpop.f32.mrf.mxu0 }
  0xad   :  { %v102_v36 = vadd.f32 %v218_v34, %v101_v35 }
  0xaf   :  { %v107_v37 = vmax.f32 %v102_v36, 0.0 }
  0xb1   :  { %147 = vmatmul.f32.vlgmr.msra.gmra.mxu1 %v107_v37 }
  0xb2   :  { %v104_v38 = vpop.f32.mrf.mxu2 }
  0xb3   :  { %v105_v39 = vadd.f32 %v218_v34, %v104_v38 }
  0xb5   :  { %v108_v40 = vmax.f32 %v105_v39, 0.0 }
  0xb7   :  { %150 = vmatmul.f32.vlgmr.msra.gmra.mxu3 %v108_v40 }
 0x12e   :  { %v148_v42 = vpop.f32.mrf.mxu1 }
 0x12f   :  { %v149_v43 = vadd.f32 %v219_v41, %v148_v42 }
 0x131   :  { %v154_v44 = vmax.f32 %v149_v43, 0.0 }
 0x133   :  { %156 = vst [vmem:[#allocation8] sm:$0xff] %v154_v44 }
 0x13a   :  { %v151_v45 = vpop.f32.mrf.mxu3 }
 0x13b   :  { %v152_v46 = vadd.f32 %v219_v41, %v151_v45 }
 0x13d   :  { %v155_v47 = vmax.f32 %v152_v46, 0.0 }
 0x13f   :  { %157 = vst [vmem:[#allocation8 + $0x8] sm:$0xff] %v155_v47 }
 0x140   :  { %170 = dma.vmem_to_hbm [thread:$0]  %s163_s29, 256, %s165_s5, [#allocation4], %s323_s20, %s323_s20, %s324_s21  }
 0x141   :  { %320 = dma.done.wait [#allocation4], 256  }
 0x142   :  { %321 = vsyncadd [#allocation4], 4294967040 }
 0x143   :  { %175 = vsyncpa [#allocation3], 1 }
 0x144   :  { %176 = vsyncpa [#allocation6], 1 }
 0x145   :  { %177 = vsyncpa [#allocation4], 1 }

</bundles_post_ra>
